<compile_context>
chip_gen: v7x
topology: tpu7x:2x2x1
jax: 0.10.0
libtpu: 0.0.40
codegen_flags: <defaults>
</compile_context>

<pallas_src>
import jax
import jax.numpy as jnp
import numpy as np
from jax.experimental import pallas as pl
from jax.experimental.pallas import tpu as pltpu

# Logical (PyTorch) sizes.
H1 = 600
H2 = 300
OUT = 1
LEAKY_SLOPE = 0.01  # nn.LeakyReLU default negative_slope

# Lane-padded sizes (multiples of 128).
H1P = 640
H2P = 384
OUTP = 128


def _round_up(x, m):
    return (x + m - 1) // m * m


def _leaky_relu(x):
    # max(x, a*x) == LeakyReLU(x) for 0 < a < 1 (2 VALU ops, no select).
    return jnp.maximum(x, LEAKY_SLOPE * x)


def critic_kernel(state_ref, action_ref, w1s_ref, w1a_ref, b1_ref,
                  w2_ref, b2_ref, w3_ref, b3_ref, o_ref):
    # Layer 1: concat([state, action]) @ W1 expressed as a split matmul
    # (avoids a wrapper concat + its HBM round trip).  bf16 into the MXU,
    # f32 accumulate; bias add / activation in f32.
    s = state_ref[...].astype(jnp.bfloat16)
    a = action_ref[...].astype(jnp.bfloat16)
    h1 = (jnp.dot(s, w1s_ref[...], preferred_element_type=jnp.float32)
          + jnp.dot(a, w1a_ref[...], preferred_element_type=jnp.float32)
          + b1_ref[...])
    h1 = _leaky_relu(h1)                       # padded lanes stay exactly 0

    # Layer 2: (TM, 640) @ (640, 384) -> full MXU tiles, f32 accumulate.
    h2 = jnp.dot(h1.astype(jnp.bfloat16), w2_ref[...],
                 preferred_element_type=jnp.float32) + b2_ref[...]
    h2 = _leaky_relu(h2)                       # padded lanes stay exactly 0

    # Layer 3 (300 -> 1): VPU broadcast-multiply + lane (XLU) reduction in full
    # f32 precision instead of a width-1 MXU matmul; write a lane-dense
    # 128-wide output so the store is an unmasked vst.
    q = jnp.sum(h2 * w3_ref[...], axis=-1, keepdims=True)
    o_ref[...] = (jnp.broadcast_to(q, o_ref.shape) + b3_ref[...]).astype(o_ref.dtype)


def critic_forward(state, action, packed_params, *, tm=256):
    """state: (B, n_states), action: (B, n_actions) -> (B, 1) float32."""
    w1s, w1a, b1, w2, b2, w3, b3 = packed_params
    B, n_states = state.shape
    n_actions = action.shape[1]

    # Batch tile: sublane multiple, capped at `tm`; pad B up to a multiple of TM.
    TM = min(_round_up(tm, 8), _round_up(B, 8))
    Bp = _round_up(B, TM)
    if Bp != B:
        state = jnp.pad(state, ((0, Bp - B), (0, 0)))
        action = jnp.pad(action, ((0, Bp - B), (0, 0)))

    def batch_map(i):
        return (i, 0)

    def const_map(i):
        return (0, 0)

    in_specs = [
        pl.BlockSpec((TM, n_states), batch_map),
        pl.BlockSpec((TM, n_actions), batch_map),
        # Weights / biases: constant-index full-array blocks -> stay VMEM-resident
        # across all grid steps (no re-fetch).
        pl.BlockSpec(w1s.shape, const_map),
        pl.BlockSpec(w1a.shape, const_map),
        pl.BlockSpec(b1.shape, const_map),
        pl.BlockSpec(w2.shape, const_map),
        pl.BlockSpec(b2.shape, const_map),
        pl.BlockSpec(w3.shape, const_map),
        pl.BlockSpec(b3.shape, const_map),
    ]
    out_spec = pl.BlockSpec((TM, OUTP), batch_map)

    out = pl.pallas_call(
        critic_kernel,
        out_shape=jax.ShapeDtypeStruct((Bp, OUTP), jnp.float32),
        grid=(Bp // TM,),
        in_specs=in_specs,
        out_specs=out_spec,
        compiler_params=pltpu.CompilerParams(
            dimension_semantics=("parallel",),
            vmem_limit_bytes=32 * 1024 * 1024,
        ),
    )(state, action, w1s, w1a, b1, w2, b2, w3, b3)

    return out[:B, :OUT]


def init_params(key, n_states, n_actions, init_w=0.001):
    """Unpadded f32 params; weights stored as (in_features, out_features)."""
    n_in = n_states + n_actions
    k = jax.random.split(key, 6)

    def uniform(kk, shape, bound):
        return jax.random.uniform(kk, shape, jnp.float32, -bound, bound)

    # fanin_init on the PyTorch (out, in) weight uses fanin = out_features.
    w1 = uniform(k[0], (n_in, H1), 1.0 / np.sqrt(H1))
    b1 = uniform(k[1], (1, H1), 1.0 / np.sqrt(n_in))   # default nn.Linear bias init
    w2 = uniform(k[2], (H1, H2), 1.0 / np.sqrt(H2))
    b2 = uniform(k[3], (1, H2), 1.0 / np.sqrt(H1))
    w3 = uniform(k[4], (H2, OUT), init_w)
    b3 = uniform(k[5], (1, OUT), 1.0 / np.sqrt(H2))
    return (w1, b1, w2, b2, w3, b3)


def pack_params(params, n_states, n_actions):
    """Zero-pad to lane-aligned sizes, split W1 by input, cast big weights to bf16."""
    w1, b1, w2, b2, w3, b3 = params

    w1p = jnp.zeros((n_states + n_actions, H1P), jnp.float32).at[:, :H1].set(w1)
    w1s = w1p[:n_states].astype(jnp.bfloat16)
    w1a = w1p[n_states:].astype(jnp.bfloat16)
    b1p = jnp.zeros((1, H1P), jnp.float32).at[:, :H1].set(b1)

    w2p = (jnp.zeros((H1P, H2P), jnp.float32).at[:H1, :H2].set(w2)
           .astype(jnp.bfloat16))
    b2p = jnp.zeros((1, H2P), jnp.float32).at[:, :H2].set(b2)

    # Final layer kept in full f32 (it is tiny: one 384-wide vector + scalar bias).
    w3p = jnp.zeros((1, H2P), jnp.float32).at[:, :H2].set(w3[:, 0][None, :])
    b3p = jnp.full((1, OUTP), b3[0, 0], jnp.float32)

    return (w1s, w1a, b1p, w2p, b2p, w3p, b3p)


def critic_reference_f32(state, action, params):
    """Pure-f32 reference matching the PyTorch module's math."""
    w1, b1, w2, b2, w3, b3 = params
    x = jnp.concatenate([state, action], axis=1)
    h1 = _leaky_relu(x @ w1 + b1)
    h2 = _leaky_relu(h1 @ w2 + b2)
    return h2 @ w3 + b3


def critic_reference_kernel_math(state, action, packed):
    """Same math as the kernel (bf16 weights, f32 accumulate), in plain JAX."""
    w1s, w1a, b1, w2, b2, w3, b3 = packed
    s = state.astype(jnp.bfloat16)
    a = action.astype(jnp.bfloat16)
    h1 = _leaky_relu(jnp.dot(s, w1s, preferred_element_type=jnp.float32)
                     + jnp.dot(a, w1a, preferred_element_type=jnp.float32) + b1)
    h2 = _leaky_relu(jnp.dot(h1.astype(jnp.bfloat16), w2,
                             preferred_element_type=jnp.float32) + b2)
    return jnp.sum(h2 * w3, axis=-1, keepdims=True) + b3[:, :OUT]


if __name__ == "__main__":
    key = jax.random.PRNGKey(0)
    k_s, k_a, k_p = jax.random.split(key, 3)

    batch = 2
    n_states = 8
    n_actions = 4

    state = jax.random.normal(k_s, (batch, n_states), dtype=jnp.float32)
    action = jax.random.normal(k_a, (batch, n_actions), dtype=jnp.float32)

    params = init_params(k_p, n_states, n_actions)
    packed = pack_params(params, n_states, n_actions)

    out = critic_forward(state, action, packed)
    out = jax.block_until_ready(out)
    assert out.shape == (batch, OUT)

    # Tight check against the same (bf16-weight) math done in plain JAX.
    ref_bits = critic_reference_kernel_math(state, action, packed)
    np.testing.assert_allclose(np.asarray(out), np.asarray(ref_bits),
                               rtol=1e-4, atol=1e-4)

    # Loose check against the original full-f32 module semantics.
    ref_f32 = critic_reference_f32(state, action, params)
    np.testing.assert_allclose(np.asarray(out), np.asarray(ref_f32),
                               rtol=2e-2, atol=2e-2)

    print("KERNEL_OK")
</pallas_src>

<mosaic_0001>
module attributes {stable_mosaic.version = 11 : i64} {
  func.func @critic_kernel(%arg0: i32, %arg1: memref<8x8xf32, #tpu.memory_space<vmem>>, %arg2: memref<8x4xf32, #tpu.memory_space<vmem>>, %arg3: memref<8x640xbf16, #tpu.memory_space<vmem>>, %arg4: memref<4x640xbf16, #tpu.memory_space<vmem>>, %arg5: memref<1x640xf32, #tpu.memory_space<vmem>>, %arg6: memref<640x384xbf16, #tpu.memory_space<vmem>>, %arg7: memref<1x384xf32, #tpu.memory_space<vmem>>, %arg8: memref<1x384xf32, #tpu.memory_space<vmem>>, %arg9: memref<1x128xf32, #tpu.memory_space<vmem>>, %arg10: memref<8x128xf32, #tpu.memory_space<vmem>>) attributes {dimension_semantics = [#tpu.dimension_semantics<parallel>], iteration_bounds = array<i64: 1>, scalar_prefetch = 0 : i64, scratch_operands = 0 : i64, tpu.core_type = #tpu.core_type<tc>, window_params = [{transform_indices = @transform_0, window_bounds = array<i64: 8, 8>}, {transform_indices = @transform_1, window_bounds = array<i64: 8, 4>}, {pipeline_mode = #tpu.pipeline_mode<synchronous>, transform_indices = @transform_2, window_bounds = array<i64: 8, 640>}, {pipeline_mode = #tpu.pipeline_mode<synchronous>, transform_indices = @transform_3, window_bounds = array<i64: 4, 640>}, {pipeline_mode = #tpu.pipeline_mode<synchronous>, transform_indices = @transform_4, window_bounds = array<i64: 1, 640>}, {pipeline_mode = #tpu.pipeline_mode<synchronous>, transform_indices = @transform_5, window_bounds = array<i64: 640, 384>}, {pipeline_mode = #tpu.pipeline_mode<synchronous>, transform_indices = @transform_6, window_bounds = array<i64: 1, 384>}, {pipeline_mode = #tpu.pipeline_mode<synchronous>, transform_indices = @transform_7, window_bounds = array<i64: 1, 384>}, {pipeline_mode = #tpu.pipeline_mode<synchronous>, transform_indices = @transform_8, window_bounds = array<i64: 1, 128>}, {transform_indices = @transform_9, window_bounds = array<i64: 8, 128>}]} {
    %c0 = arith.constant 0 : index
    %c0_0 = arith.constant 0 : index
    %0 = vector.load %arg1[%c0, %c0_0] : memref<8x8xf32, #tpu.memory_space<vmem>>, vector<8x8xf32>
    %1 = arith.truncf %0 : vector<8x8xf32> to vector<8x8xbf16>
    %c0_1 = arith.constant 0 : index
    %c0_2 = arith.constant 0 : index
    %2 = vector.load %arg2[%c0_1, %c0_2] : memref<8x4xf32, #tpu.memory_space<vmem>>, vector<8x4xf32>
    %3 = arith.truncf %2 : vector<8x4xf32> to vector<8x4xbf16>
    %c0_3 = arith.constant 0 : index
    %c0_4 = arith.constant 0 : index
    %4 = vector.load %arg3[%c0_3, %c0_4] : memref<8x640xbf16, #tpu.memory_space<vmem>>, vector<8x640xbf16>
    %cst = arith.constant dense<0.000000e+00> : vector<8x640xf32>
    %5 = tpu.matmul %1, %4, %cst {dimension_numbers = #tpu.dot_dimension_numbers<[1], [0], [0], [1], [0, 0, 1, 1], [], []>} : vector<8x8xbf16>, vector<8x640xbf16>, vector<8x640xf32> -> vector<8x640xf32>
    %c0_5 = arith.constant 0 : index
    %c0_6 = arith.constant 0 : index
    %6 = vector.load %arg4[%c0_5, %c0_6] : memref<4x640xbf16, #tpu.memory_space<vmem>>, vector<4x640xbf16>
    %cst_7 = arith.constant dense<0.000000e+00> : vector<8x640xf32>
    %7 = tpu.matmul %3, %6, %cst_7 {dimension_numbers = #tpu.dot_dimension_numbers<[1], [0], [0], [1], [0, 0, 1, 1], [], []>} : vector<8x4xbf16>, vector<4x640xbf16>, vector<8x640xf32> -> vector<8x640xf32>
    %8 = arith.addf %5, %7 : vector<8x640xf32>
    %c0_8 = arith.constant 0 : index
    %c0_9 = arith.constant 0 : index
    %9 = vector.load %arg5[%c0_8, %c0_9] : memref<1x640xf32, #tpu.memory_space<vmem>>, vector<1x640xf32>
    %10 = vector.broadcast %9 : vector<1x640xf32> to vector<8x640xf32>
    %11 = arith.addf %8, %10 : vector<8x640xf32>
    %cst_10 = arith.constant 0.00999999977 : f32
    %12 = vector.broadcast %cst_10 : f32 to vector<8x640xf32>
    %13 = arith.mulf %12, %11 : vector<8x640xf32>
    %14 = arith.maximumf %11, %13 : vector<8x640xf32>
    %15 = arith.truncf %14 : vector<8x640xf32> to vector<8x640xbf16>
    %c0_11 = arith.constant 0 : index
    %c0_12 = arith.constant 0 : index
    %16 = vector.load %arg6[%c0_11, %c0_12] : memref<640x384xbf16, #tpu.memory_space<vmem>>, vector<640x384xbf16>
    %cst_13 = arith.constant dense<0.000000e+00> : vector<8x384xf32>
    %17 = tpu.matmul %15, %16, %cst_13 {dimension_numbers = #tpu.dot_dimension_numbers<[1], [0], [0], [1], [0, 0, 1, 1], [], []>} : vector<8x640xbf16>, vector<640x384xbf16>, vector<8x384xf32> -> vector<8x384xf32>
    %c0_14 = arith.constant 0 : index
    %c0_15 = arith.constant 0 : index
    %18 = vector.load %arg7[%c0_14, %c0_15] : memref<1x384xf32, #tpu.memory_space<vmem>>, vector<1x384xf32>
    %19 = vector.broadcast %18 : vector<1x384xf32> to vector<8x384xf32>
    %20 = arith.addf %17, %19 : vector<8x384xf32>
    %cst_16 = arith.constant 0.00999999977 : f32
    %21 = vector.broadcast %cst_16 : f32 to vector<8x384xf32>
    %22 = arith.mulf %21, %20 : vector<8x384xf32>
    %23 = arith.maximumf %20, %22 : vector<8x384xf32>
    %c0_17 = arith.constant 0 : index
    %c0_18 = arith.constant 0 : index
    %24 = vector.load %arg8[%c0_17, %c0_18] : memref<1x384xf32, #tpu.memory_space<vmem>>, vector<1x384xf32>
    %25 = vector.broadcast %24 : vector<1x384xf32> to vector<8x384xf32>
    %26 = arith.mulf %23, %25 : vector<8x384xf32>
    %cst_19 = arith.constant dense<0.000000e+00> : vector<8xf32>
    %27 = vector.multi_reduction <add>, %26, %cst_19 [1] : vector<8x384xf32> to vector<8xf32>
    %28 = vector.shape_cast %27 : vector<8xf32> to vector<8x1xf32>
    %29 = vector.shape_cast %28 : vector<8x1xf32> to vector<8x1xf32>
    %30 = vector.broadcast %29 : vector<8x1xf32> to vector<8x128xf32>
    %c0_20 = arith.constant 0 : index
    %c0_21 = arith.constant 0 : index
    %31 = vector.load %arg9[%c0_20, %c0_21] : memref<1x128xf32, #tpu.memory_space<vmem>>, vector<1x128xf32>
    %32 = vector.broadcast %31 : vector<1x128xf32> to vector<8x128xf32>
    %33 = arith.addf %30, %32 : vector<8x128xf32>
    %c0_22 = arith.constant 0 : index
    %c0_23 = arith.constant 0 : index
    %34 = vector.load %arg10[%c0_22, %c0_23] : memref<8x128xf32, #tpu.memory_space<vmem>>, vector<8x128xf32>
    tpu.vector_store %arg10[%c0_22, %c0_23], %33 {strides = array<i32>} : memref<8x128xf32, #tpu.memory_space<vmem>>, vector<8x128xf32>,
    return
  }
  func.func @transform_0(%arg0: i32) -> (i32, i32) {
    %c0_i32 = arith.constant 0 : i32
    %c0_i32_0 = arith.constant 0 : i32
    return %arg0, %c0_i32 : i32, i32
  }
  func.func @transform_1(%arg0: i32) -> (i32, i32) {
    %c0_i32 = arith.constant 0 : i32
    %c0_i32_0 = arith.constant 0 : i32
    return %arg0, %c0_i32 : i32, i32
  }
  func.func @transform_2(%arg0: i32) -> (i32, i32) {
    %c0_i32 = arith.constant 0 : i32
    %c0_i32_0 = arith.constant 0 : i32
    %c0_i32_1 = arith.constant 0 : i32
    return %c0_i32, %c0_i32_0 : i32, i32
  }
  func.func @transform_3(%arg0: i32) -> (i32, i32) {
    %c0_i32 = arith.constant 0 : i32
    %c0_i32_0 = arith.constant 0 : i32
    %c0_i32_1 = arith.constant 0 : i32
    return %c0_i32, %c0_i32_0 : i32, i32
  }
  func.func @transform_4(%arg0: i32) -> (i32, i32) {
    %c0_i32 = arith.constant 0 : i32
    %c0_i32_0 = arith.constant 0 : i32
    %c0_i32_1 = arith.constant 0 : i32
    return %c0_i32, %c0_i32_0 : i32, i32
  }
  func.func @transform_5(%arg0: i32) -> (i32, i32) {
    %c0_i32 = arith.constant 0 : i32
    %c0_i32_0 = arith.constant 0 : i32
    %c0_i32_1 = arith.constant 0 : i32
    return %c0_i32, %c0_i32_0 : i32, i32
  }
  func.func @transform_6(%arg0: i32) -> (i32, i32) {
    %c0_i32 = arith.constant 0 : i32
    %c0_i32_0 = arith.constant 0 : i32
    %c0_i32_1 = arith.constant 0 : i32
    return %c0_i32, %c0_i32_0 : i32, i32
  }
  func.func @transform_7(%arg0: i32) -> (i32, i32) {
    %c0_i32 = arith.constant 0 : i32
    %c0_i32_0 = arith.constant 0 : i32
    %c0_i32_1 = arith.constant 0 : i32
    return %c0_i32, %c0_i32_0 : i32, i32
  }
  func.func @transform_8(%arg0: i32) -> (i32, i32) {
    %c0_i32 = arith.constant 0 : i32
    %c0_i32_0 = arith.constant 0 : i32
    %c0_i32_1 = arith.constant 0 : i32
    return %c0_i32, %c0_i32_0 : i32, i32
  }
  func.func @transform_9(%arg0: i32) -> (i32, i32) {
    %c0_i32 = arith.constant 0 : i32
    %c0_i32_0 = arith.constant 0 : i32
    return %arg0, %c0_i32 : i32, i32
  }
}

</mosaic_0001>

<bundles_post_ra>
// kernel: tpu_custom_call.1
= control target key start
LH: loop header
LB: loop body
LE: loop exit
PB: predicated region body
PF: predicated region fallthrough
CT: control target
= control target key end

     0   :  { %14 = vsyncpa [#allocation3], 0  ;;  %s2237_s0 = inlined_call_operand.vmem [shape: f32[8,8], index: 0, kind: input, shape index: {}]   ;;  %s2238_s1 = inlined_call_operand.vmem [shape: f32[8,4], index: 1, kind: input, shape index: {}]   ;;  %s2239_s2 = inlined_call_operand.hbm [shape: bf16[8,640], index: 2, kind: input, shape index: {}]   ;;  %s2240_s3 = inlined_call_operand.vmem [shape: bf16[4,640], index: 3, kind: input, shape index: {}]   ;;  %s2241_s4 = inlined_call_operand.vmem [shape: f32[1,640], index: 4, kind: input, shape index: {}]   ;;  %s2242_s5 = inlined_call_operand.hbm [shape: bf16[640,384], index: 5, kind: input, shape index: {}]   ;;  %s2243_s6 = inlined_call_operand.vmem [shape: f32[1,384], index: 6, kind: input, shape index: {}]   ;;  %s2244_s7 = inlined_call_operand.vmem [shape: f32[1,384], index: 7, kind: input, shape index: {}]   ;;  %s2245_s8 = inlined_call_operand.vmem [shape: f32[1,128], index: 8, kind: input, shape index: {}]   ;;  %s2246_s9 = inlined_call_operand.hbm [shape: f32[8,128], index: 9, kind: output, shape index: {}]  }
   0x1   :  { %15 = vsyncpa [#allocation6], 0 }
   0x2   :  { %16 = vsyncpa [#allocation4], 0  ;;  %s2035_s30 = smov [#allocation2]   ;;  %s2036_s11 = smov [#allocation5]  }
   0x3   :  { %s27_s10 = sshll.u32 %s2035_s30, 4  ;;  %s40_s12 = sshll.u32 %s2036_s11, 4  ;;  %s28_s10 = int_to_ptr.vmem [resolvable:$true] %s27_s10  ;;  %s2094_s12 = int_to_ptr.vmem [resolvable:$true] %s40_s12 }
   0x4   :  { %s1963_s15 = scalar_lea.hbm %s2239_s2, 320 }
   0x5   :  { %p1964_p0 = scmp.ne.s32.totalorder %s2239_s2, %s1963_s15  ;;  %p1967_p1 = scmp.lt.u32.totalorder %s1963_s15, %s2239_s2 }
   0x7   :  { %p1969_p2 = pnand %p1967_p1, %p1964_p0 }
   0x9   :  { %1972 = shalt.err (!%p1969_p2)
}
   0xa   :  { %s1973_s20 = scalar_lea.vmem %s28_s10, 320  ;;  %p1978_p4 = scmp.lt.s32.totalorder %s28_s10, %s28_s10 }
   0xb   :  { %p1974_p3 = scmp.ne.s32.totalorder %s28_s10, %s1973_s20  ;;  %p1979_p5 = scmp.lt.s32.totalorder %s1973_s20, %s1973_s20 }
   0xd   :  { %p1980_p6 = por %p1979_p5, %p1978_p4 }
   0xf   :  { %p1981_p7 = pnand %p1980_p6, %p1974_p3 }
  0x11   :  { %1984 = shalt.err (!%p1981_p7)
}
  0x12   :  { %30 = dma.hbm_to_vmem [thread:$0]  %s2239_s2, 320, %s28_s10, [#allocation3]  }
  0x13   :  { %s1985_s25 = scalar_lea.hbm %s2242_s5, 15360 }
  0x14   :  { %p1986_p8 = scmp.ne.s32.totalorder %s2242_s5, %s1985_s25  ;;  %p1989_p9 = scmp.lt.u32.totalorder %s1985_s25, %s2242_s5 }
  0x16   :  { %p1991_p10 = pnand %p1989_p9, %p1986_p8 }
  0x18   :  { %1994 = shalt.err (!%p1991_p10)
}
  0x19   :  { %s1995_s30 = scalar_lea.vmem %s2094_s12, 15360  ;;  %p2000_p12 = scmp.lt.s32.totalorder %s2094_s12, %s2094_s12 }
  0x1a   :  { %p1996_p11 = scmp.ne.s32.totalorder %s2094_s12, %s1995_s30  ;;  %p2001_p13 = scmp.lt.s32.totalorder %s1995_s30, %s1995_s30 }
  0x1c   :  { %p2002_p0 = por %p2001_p13, %p2000_p12 }
  0x1e   :  { %p2003_p1 = pnand %p2002_p0, %p1996_p11 }
  0x20   :  { %2006 = shalt.err (!%p2003_p1)
}
  0x21   :  { %s2037_s2 = smov 192   ;;  %s2038_s10 = smov 12  }
  0x22   :  { %46 = dma.hbm_to_vmem [thread:$0]  %s2242_s5, 15360, %s2094_s12, [#allocation6], %s2037_s2, %s2037_s2, %s2038_s10  }
  0x23   :  { %2029 = dma.done.wait [#allocation3], 320  }
  0x24   :  { %2030 = vsyncadd [#allocation3], 4294966976 }
  0x25   :  { %2031 = dma.done.wait [#allocation6], 15360  }
  0x26   :  { %2032 = vsyncadd [#allocation6], 4294951936  ;;  %v75_v0 = vlaneseq  ;;  %v2039_v1 = vmov 1983009808   ;;  %v2040_v3 = vmov 0   ;;  %v67_v7 = vld [vmem:[%s2240_s3] sm:$0xff] }
  0x27   :  { %v73_v2 = vunpack.c.l.s4 %v2039_v1  ;;  %147 = vmatprep.mubr.bf16.mxu0 %v2040_v3  ;;  %188 = vmatprep.mubr.bf16.mxu1 %v2040_v3  ;;  %vm99_vm0 = vcmask 1041408   ;;  %v71_v9 = vcombine.high %v67_v7, %v67_v7  ;;  %v62_v10 = vld [vmem:[%s2238_s1] sm:$0xff]  ;;  %v1554_v15 = vld.sshfl [vmem:[%s2240_s3 + $0x8] sm:$0x3 pattern:$0x76325410] }
  0x28   :  { %v2127_v4 = vshrl.u32 %v75_v0, 7  ;;  %v64_v11 = vld [vmem:[#allocation2] sm:$0xff]  ;;  %v63_v16 = vpack.c.bf16 %v62_v10, %v62_v10  ;;  %v65_v17 = vld [vmem:[#allocation2 + $0x8] sm:$0xff]  ;;  %vm95_vm1 = vcmask 31744   ;;  %vm254_vm2 = vcmask 1043456   ;;  %s2043_s22 = smov [#allocation7]  }
  0x29   :  { %v74_v5 = vunpack.c.0.s8 %v73_v2  ;;  %v1561_v20 = vcombine.high %v64_v11, %v64_v11  ;;  %v1560_v21 = vcombine.low %v64_v11, %v64_v11  ;;  %v2041_v22 = vmov 0.0   ;;  %v60_v27 = vld [vmem:[%s2237_s0] sm:$0xff]  ;;  %v1800_v28 = vld [vmem:[#allocation2 + $0x10] ss:$0 sps:$4 sm:$0xff]   ;;  %v1806_v38 = vld [vmem:[#allocation5 + $0x18] ss:$12 sps:$4 sm:$0xff]  }
  0x2a   :  { %v113_v23 = vsel %vm99_vm0, %v1554_v15, 0  ;;  %v1563_v24 = vcombine.high %v65_v17, %v65_v17  ;;  %vm2042_vm3 = vmmov 0   ;;  %v1562_v26 = vcombine.low %v65_v17, %v65_v17  ;;  %v1805_v31 = vld [vmem:[#allocation5 + $0x4] ss:$12 sps:$4 sm:$0xff]   ;;  %v1803_v34 = vld [vmem:[#allocation5] ss:$12 sps:$4 sm:$0xff]  }
  0x2b   :  { %v77_v6 = vsub.s32 %v74_v5, %v2127_v4  ;;  %v256_v25 = vsel %vm254_vm2, %v1560_v21, 0  ;;  %v61_v29 = vpack.c.bf16 %v60_v27, %v60_v27  ;;  %vm250_vm4 = vcmask 64512   ;;  %v1835_v33 = vld [vmem:[#allocation5 + $0x304] ss:$12 sps:$4 sm:$0xff]   ;;  %v1808_v35 = vld [vmem:[#allocation5 + $0x1c] ss:$12 sps:$4 sm:$0xff]  }
  0x2c   :  { %v262_v30 = vsel %vm254_vm2, %v1562_v26, 0  ;;  %v268_v32 = vsel %vm254_vm2, %v1800_v28, 0  ;;  %v1833_v36 = vld [vmem:[#allocation5 + $0x300] ss:$12 sps:$4 sm:$0xff]   ;;  %v1841_v37 = vld [vmem:[#allocation5 + $0x31c] ss:$12 sps:$4 sm:$0xff]  }
  0x2d   :  { %v78_v8 = vrot.slane %v67_v7, %v77_v6  ;;  %v85_v14 = vrot.slane %v71_v9, %v77_v6  ;;  %v1811_v39 = vld [vmem:[#allocation5 + $0x34] ss:$12 sps:$4 sm:$0xff]   ;;  %v1839_v40 = vld [vmem:[#allocation5 + $0x318] ss:$12 sps:$4 sm:$0xff]   ;;  %v1809_v41 = vld [vmem:[#allocation5 + $0x30] ss:$12 sps:$4 sm:$0xff]  }
  0x2e   :  { %v1814_v42 = vld [vmem:[#allocation5 + $0x4c] ss:$12 sps:$4 sm:$0xff]   ;;  %v1812_v43 = vld [vmem:[#allocation5 + $0x48] ss:$12 sps:$4 sm:$0xff]   ;;  %v1817_v44 = vld [vmem:[#allocation5 + $0x64] ss:$12 sps:$4 sm:$0xff]  }
  0x2f   :  { %v86_v12 = vcombine.high %v78_v8, %v78_v8  ;;  %v101_v13 = vsel %vm99_vm0, %v78_v8, 0  ;;  %v87_v18 = vcombine.high %v85_v14, %v85_v14  ;;  %v107_v19 = vsel %vm99_vm0, %v85_v14, 0  ;;  %v1815_v45 = vld [vmem:[#allocation5 + $0x60] ss:$12 sps:$4 sm:$0xff]   ;;  %v1820_v46 = vld [vmem:[#allocation5 + $0x7c] ss:$12 sps:$4 sm:$0xff]  }
  0x30   :  { %v1818_v47 = vld [vmem:[#allocation5 + $0x78] ss:$12 sps:$4 sm:$0xff]   ;;  %v1823_v48 = vld [vmem:[#allocation5 + $0x94] ss:$12 sps:$4 sm:$0xff]   ;;  %v1821_v49 = vld [vmem:[#allocation5 + $0x90] ss:$12 sps:$4 sm:$0xff]  }
  0x31   :  { %1555 = vmatprep.subr.msk.bf16.mxu0 %vm99_vm0, %v86_v12  ;;  %1557 = vmatprep.subr.msk.bf16.mxu1 %vm99_vm0, %v87_v18  ;;  %v1826_v50 = vld [vmem:[#allocation5 + $0xac] ss:$12 sps:$4 sm:$0xff]   ;;  %v1824_v51 = vld [vmem:[#allocation5 + $0xa8] ss:$12 sps:$4 sm:$0xff]   ;;  %v1829_v52 = vld [vmem:[#allocation5 + $0xc4] ss:$12 sps:$4 sm:$0xff]  }
  0x32   :  { %116 = vmatpush1.bf16.msra.mxu0 %v101_v13  ;;  %157 = vmatpush1.bf16.msra.mxu1 %v107_v19  ;;  %v1827_v53 = vld [vmem:[#allocation5 + $0xc0] ss:$12 sps:$4 sm:$0xff]   ;;  %v1832_v54 = vld [vmem:[#allocation5 + $0xdc] ss:$12 sps:$4 sm:$0xff]   ;;  %v1830_v55 = vld [vmem:[#allocation5 + $0xd8] ss:$12 sps:$4 sm:$0xff]  }
  0x33   :  { %1748 = vmatprep.subr.bf16.mxu0 %v2041_v22  ;;  %1565 = vmatprep.subr.msk.bf16.mxu1 %vm254_vm2, %v1561_v20  ;;  %v1838_v56 = vld [vmem:[#allocation5 + $0xf4] ss:$12 sps:$4 sm:$0xff]   ;;  %v1836_v57 = vld [vmem:[#allocation5 + $0xf0] ss:$12 sps:$4 sm:$0xff]   ;;  %v1844_v58 = vld [vmem:[#allocation5 + $0x10c] ss:$12 sps:$4 sm:$0xff]  }
  0x34   :  { %v1842_v59 = vld [vmem:[#allocation5 + $0x108] ss:$12 sps:$4 sm:$0xff]   ;;  %v1845_v61 = vld [vmem:[#allocation5 + $0x330] ss:$12 sps:$4 sm:$0xff]   ;;  %v1848_v63 = vld [vmem:[#allocation5 + $0x120] ss:$12 sps:$4 sm:$0xff]  }
  0x35   :  { %1556 = vmatmul.mubr.msk.bf16.vlgmr.msra.gmra.mrb[0].mxu0 %vm95_vm1, %v63_v16  ;;  %1558 = vmatmul.mubr.msk.bf16.vlgmr.msra.gmra.mrb[0].mxu1 %vm95_vm1, %v63_v16  ;;  %v1847_v60 = vld [vmem:[#allocation5 + $0x334] ss:$12 sps:$4 sm:$0xff]   ;;  %v1850_v62 = vld [vmem:[#allocation5 + $0x124] ss:$12 sps:$4 sm:$0xff]   ;;  %v1853_v1 = vld [vmem:[#allocation5 + $0x34c] ss:$12 sps:$4 sm:$0xff]  }
  0x36   :  { %1749 = vmatpush3.bf16.msra.mxu0 %v113_v23  ;;  %1750 = vmatprep.mubr.msk.bf16.mxu0 %vm2042_vm3, %v2041_v22  ;;  %v1851_v0 = vld [vmem:[#allocation5 + $0x348] ss:$12 sps:$4 sm:$0xff]   ;;  %v1859_v5 = vld [vmem:[#allocation5 + $0x364] ss:$12 sps:$4 sm:$0xff]   ;;  %v1857_v6 = vld [vmem:[#allocation5 + $0x360] ss:$12 sps:$4 sm:$0xff]  }
  0x37   :  { %1567 = vmatprep.subr.msk.bf16.mxu0 %vm254_vm2, %v1563_v24  ;;  %271 = vmatpush1.bf16.msra.mxu1 %v256_v25  ;;  %v1856_v2 = vld [vmem:[#allocation5 + $0x13c] ss:$12 sps:$4 sm:$0xff]   ;;  %v1862_v7 = vld [vmem:[#allocation5 + $0x154] ss:$12 sps:$4 sm:$0xff]   ;;  %v1863_v10 = vld [vmem:[#allocation5 + $0x378] ss:$12 sps:$4 sm:$0xff]  }
  0x38   :  { %302 = vmatprep.mubr.bf16.mxu1 %v2040_v3  ;;  %1754 = vmatprep.subr.bf16.mxu1 %v2041_v22  ;;  %v1860_v8 = vld [vmem:[#allocation5 + $0x150] ss:$12 sps:$4 sm:$0xff]   ;;  %v1868_v11 = vld [vmem:[#allocation5 + $0x16c] ss:$12 sps:$4 sm:$0xff]   ;;  %v1866_v12 = vld [vmem:[#allocation5 + $0x168] ss:$12 sps:$4 sm:$0xff]  }
  0x39   :  { %v1865_v9 = vld [vmem:[#allocation5 + $0x37c] ss:$12 sps:$4 sm:$0xff]   ;;  %v1871_v13 = vld [vmem:[#allocation5 + $0x394] ss:$12 sps:$4 sm:$0xff]   ;;  %v1874_v15 = vld [vmem:[#allocation5 + $0x184] ss:$12 sps:$4 sm:$0xff]  }
  0x3a   :  { %v1869_v14 = vld [vmem:[#allocation5 + $0x390] ss:$12 sps:$4 sm:$0xff]   ;;  %v1875_v17 = vld [vmem:[#allocation5 + $0x3a8] ss:$12 sps:$4 sm:$0xff]   ;;  %v2168_v28 = vsub.s32 0, %v2127_v4  ;;  %s1544_s23 = sshll.u32 %s2043_s22, 4  ;;  %s1545_s23 = int_to_ptr.vmem [resolvable:$true] %s1544_s23 }
  0x3b   :  { %v1881_v18 = vld [vmem:[#allocation5 + $0xc8] ss:$12 sps:$4 sm:$0xff]   ;;  %s2007_s24 = scalar_lea.vmem %s1545_s23, 128  ;;  %p2012_p3 = scmp.lt.s32.totalorder %s1545_s23, %s1545_s23 }
  0x3c   :  { %p2008_p2 = scmp.ne.s32.totalorder %s1545_s23, %s2007_s24  ;;  %p2013_p4 = scmp.lt.s32.totalorder %s2007_s24, %s2007_s24 }
  0x3d   :  { %1751 = vmatmul.mubr.msk.bf16.vlgmr.msra.gmra.mrb[4].mxu0 %vm95_vm1, %v63_v16  ;;  %1566 = vmatmul.mubr.msk.bf16.vlgmr.msra.gmra.mrb[4].mxu1 %vm250_vm4, %v61_v29  ;;  %v1877_v16 = vld [vmem:[#allocation5 + $0x3ac] ss:$12 sps:$4 sm:$0xff]  }
  0x3e   :  { %312 = vmatpush1.bf16.msra.mxu0 %v262_v30  ;;  %343 = vmatprep.mubr.bf16.mxu0 %v2040_v3  ;;  %v2174_v30 = vsub.s32 1, %v2127_v4  ;;  %p2014_p5 = por %p2013_p4, %p2012_p3 }
  0x3f   :  { %1256 = vmatprep.subr.bf16.mxu0 %v1805_v31  ;;  %1755 = vmatpush3.bf16.msra.mxu1 %v268_v32 }
  0x40   :  { %1756 = vmatprep.mubr.msk.bf16.mxu1 %vm2042_vm3, %v2041_v22  ;;  %1338 = vmatprep.subr.bf16.mxu1 %v1835_v33  ;;  %p2015_p6 = pnand %p2014_p5, %p2008_p2 }
  0x45   :  { %1568 = vmatmul.mubr.msk.bf16.vlgmr.msra.gmra.mrb[8].mxu0 %vm250_vm4, %v61_v29  ;;  %1757 = vmatmul.mubr.msk.bf16.vlgmr.msra.gmra.mrb[8].mxu1 %vm250_vm4, %v61_v29  ;;  %v392_v29 = vld [vmem:[%s2241_s4] sm:$0x1f] }
  0x46   :  { %1257 = vmatpush1.bf16.msra.mxu0 %v1803_v34  ;;  %1339 = vmatpush1.bf16.msra.mxu1 %v1833_v36  ;;  %v397_v32 = vrot.slane %v392_v29, %v2168_v28 }
  0x47   :  { %1258 = vmatprep.subr.bf16.mxu0 %v1808_v35  ;;  %1370 = vmatprep.mubr.bf16.mxu1 %v2040_v3  ;;  %v1854_v3 = vld [vmem:[#allocation5 + $0x138] ss:$12 sps:$4 sm:$0xff]   ;;  %v401_v35 = vrot.slane %v392_v29, %v2174_v30 }
  0x48   :  { %1340 = vmatprep.subr.bf16.mxu1 %v1841_v37 }
  0x4a   :  { %1259 = vmatpush1.bf16.msra.mxu0 %v1806_v38  ;;  %1341 = vmatpush1.bf16.msra.mxu1 %v1839_v40  ;;  %v2179_v40 = vsub.s32 2, %v2127_v4 }
  0x4b   :  { %1260 = vmatprep.subr.bf16.mxu0 %v1811_v39  ;;  %1342 = vmatprep.subr.bf16.mxu1 %v1847_v60 }
  0x4e   :  { %1261 = vmatpush1.bf16.msra.mxu0 %v1809_v41  ;;  %1343 = vmatpush1.bf16.msra.mxu1 %v1845_v61 }
  0x4f   :  { %1262 = vmatprep.subr.bf16.mxu0 %v1814_v42  ;;  %1344 = vmatprep.subr.bf16.mxu1 %v1853_v1 }
  0x52   :  { %1263 = vmatpush1.bf16.msra.mxu0 %v1812_v43  ;;  %1345 = vmatpush1.bf16.msra.mxu1 %v1851_v0  ;;  %v408_v43 = vsub.s32 3, %v2127_v4 }
  0x53   :  { %1264 = vmatprep.subr.bf16.mxu0 %v1817_v44  ;;  %1346 = vmatprep.subr.bf16.mxu1 %v1859_v5 }
  0x56   :  { %1265 = vmatpush1.bf16.msra.mxu0 %v1815_v45  ;;  %1347 = vmatpush1.bf16.msra.mxu1 %v1857_v6 }
  0x57   :  { %1266 = vmatprep.subr.bf16.mxu0 %v1820_v46  ;;  %1348 = vmatprep.subr.bf16.mxu1 %v1865_v9  ;;  %v412_v46 = vsub.s32 4, %v2127_v4 }
  0x5a   :  { %1267 = vmatpush1.bf16.msra.mxu0 %v1818_v47  ;;  %1349 = vmatpush1.bf16.msra.mxu1 %v1863_v10 }
  0x5b   :  { %1268 = vmatprep.subr.bf16.mxu0 %v1823_v48  ;;  %1350 = vmatprep.subr.bf16.mxu1 %v1871_v13 }
  0x5e   :  { %1269 = vmatpush1.bf16.msra.mxu0 %v1821_v49  ;;  %1351 = vmatpush1.bf16.msra.mxu1 %v1869_v14  ;;  %v405_v49 = vrot.slane %v392_v29, %v2179_v40  ;;  %v1885_v14 = vld [vmem:[#allocation5 + $0x1b4] ss:$12 sps:$4 sm:$0xff]  }
  0x5f   :  { %1270 = vmatprep.subr.bf16.mxu0 %v1826_v50  ;;  %1352 = vmatprep.subr.bf16.mxu1 %v1877_v16  ;;  %v1882_v16 = vld [vmem:[#allocation5 + $0x8] ss:$12 sps:$4 sm:$0xff]  }
  0x62   :  { %1271 = vmatpush1.bf16.msra.mxu0 %v1824_v51  ;;  %1353 = vmatpush1.bf16.msra.mxu1 %v1875_v17 }
  0x63   :  { %1272 = vmatprep.subr.bf16.mxu0 %v1829_v52  ;;  %1695 = vmatprep.subr.bf16.mxu1 %v1881_v18  ;;  %v409_v52 = vrot.slane %v392_v29, %v408_v43  ;;  %v1886_v18 = vld [vmem:[#allocation5 + $0xe0] ss:$12 sps:$4 sm:$0xff]   ;;  %v1908_v43 = vld [vmem:[#allocation5 + $0x228] ss:$12 sps:$4 sm:$0xff]  }
  0x66   :  { %1273 = vmatpush1.bf16.msra.mxu0 %v1827_v53 }
  0x67   :  { %1274 = vmatprep.subr.bf16.mxu0 %v1832_v54 }
  0x6a   :  { %1275 = vmatpush1.bf16.msra.mxu0 %v1830_v55 }
  0x6b   :  { %1276 = vmatprep.subr.bf16.mxu0 %v1838_v56  ;;  %v413_v56 = vrot.slane %v392_v29, %v412_v46  ;;  %v1893_v29 = vld [vmem:[#allocation5 + $0x1e0] ss:$12 sps:$4 sm:$0xff]   ;;  %v1916_v46 = vld [vmem:[#allocation5 + $0x170] ss:$12 sps:$4 sm:$0xff]  }
  0x6e   :  { %1277 = vmatpush1.bf16.msra.mxu0 %v1836_v57 }
  0x6f   :  { %1278 = vmatprep.subr.bf16.mxu0 %v1844_v58 }
  0x72   :  { %1279 = vmatpush1.bf16.msra.mxu0 %v1842_v59 }
  0x73   :  { %1280 = vmatprep.subr.bf16.mxu0 %v1850_v62 }
  0x76   :  { %1281 = vmatpush1.bf16.msra.mxu0 %v1848_v63 }
  0x77   :  { %1282 = vmatprep.subr.bf16.mxu0 %v1856_v2 }
  0x7a   :  { %1283 = vmatpush1.bf16.msra.mxu0 %v1854_v3  ;;  %v1872_v3 = vld [vmem:[#allocation5 + $0x180] ss:$12 sps:$4 sm:$0xff]  }
  0x7b   :  { %1284 = vmatprep.subr.bf16.mxu0 %v1862_v7 }
  0x7e   :  { %1285 = vmatpush1.bf16.msra.mxu0 %v1860_v8  ;;  %v1880_v8 = vld [vmem:[#allocation5 + $0x19c] ss:$12 sps:$4 sm:$0xff]  }
  0x7f   :  { %1286 = vmatprep.subr.bf16.mxu0 %v1868_v11  ;;  %v1878_v11 = vld [vmem:[#allocation5 + $0x198] ss:$12 sps:$4 sm:$0xff]  }
  0x82   :  { %1287 = vmatpush1.bf16.msra.mxu0 %v1866_v12 }
  0x83   :  { %1297 = vmatprep.subr.bf16.mxu0 %v1874_v15 }
 0x108   :  { %v149_v19 = vpop.f32.mrb[0].mxu0  ;;  %v190_v21 = vpop.f32.mrb[0].mxu1 }
 0x109   :  { %v151_v20 = vpop.f32.mrb[1].mxu0  ;;  %v192_v24 = vpop.f32.mrb[1].mxu1 }
 0x10a   :  { %v153_v23 = vpop.f32.mrb[2].mxu0  ;;  %v194_v26 = vpop.f32.mrb[2].mxu1 }
 0x10b   :  { %v154_v25 = vpop.f32.mrb[3].mxu0  ;;  %v195_v27 = vpop.f32.mrb[3].mxu1  ;;  %v1891_v23 = vld [vmem:[#allocation5 + $0xf8] ss:$12 sps:$4 sm:$0xff]  }
 0x10c   :  { %v1895_v25 = vld [vmem:[#allocation5 + $0x1e4] ss:$12 sps:$4 sm:$0xff]  }
 0x10d   :  { %v1892_v26 = vld [vmem:[#allocation5 + $0x38] ss:$12 sps:$4 sm:$0xff]   ;;  %v1896_v27 = vld [vmem:[#allocation5 + $0x110] ss:$12 sps:$4 sm:$0xff]  }
 0x110   :  { %v231_v31 = vpop.f32.mrb[4].mxu0  ;;  %v304_v34 = vpop.f32.mrb[4].mxu1 }
 0x111   :  { %v1752_v33 = vpop.f32.mrb[5].mxu0  ;;  %v305_v37 = vadd.f32 %v304_v34, %v149_v19  ;;  %v306_v38 = vpop.f32.mrb[5].mxu1  ;;  %v1883_v19 = vld [vmem:[#allocation5 + $0x1b0] ss:$12 sps:$4 sm:$0xff]   ;;  %v1898_v34 = vld [vmem:[#allocation5 + $0x1f8] ss:$12 sps:$4 sm:$0xff]  }
 0x112   :  { %v234_v36 = vpop.f32.mrb[6].mxu0  ;;  %v307_v41 = vadd.f32 %v306_v38, %v151_v20  ;;  %v308_v42 = vpop.f32.mrb[6].mxu1  ;;  %v1890_v20 = vld [vmem:[#allocation5 + $0x1cc] ss:$12 sps:$4 sm:$0xff]   ;;  %v1901_v33 = vld [vmem:[#allocation5 + $0x128] ss:$12 sps:$4 sm:$0xff]  }
 0x113   :  { %v1753_v39 = vpop.f32.mrb[7].mxu0  ;;  %v419_v44 = vadd.f32 %v397_v32, %v305_v37  ;;  %v309_v45 = vpop.f32.mrb[7].mxu1  ;;  %v1897_v32 = vld [vmem:[#allocation5 + $0x50] ss:$12 sps:$4 sm:$0xff]   ;;  %v1902_v36 = vld [vmem:[#allocation5 + $0x68] ss:$12 sps:$4 sm:$0xff]  }
 0x114   :  { %v420_v47 = vadd.f32 %v401_v35, %v307_v41  ;;  %v1905_v35 = vld [vmem:[#allocation5 + $0x214] ss:$12 sps:$4 sm:$0xff]   ;;  %v1903_v38 = vld [vmem:[#allocation5 + $0x210] ss:$12 sps:$4 sm:$0xff]   ;;  %v1910_v39 = vld [vmem:[#allocation5 + $0x22c] ss:$12 sps:$4 sm:$0xff]  }
 0x115   :  { %v424_v48 = vmul.f32 0.01, %v419_v44  ;;  %v1906_v37 = vld [vmem:[#allocation5 + $0x140] ss:$12 sps:$4 sm:$0xff]   ;;  %v1911_v42 = vld [vmem:[#allocation5 + $0x158] ss:$12 sps:$4 sm:$0xff]  }
 0x116   :  { %v425_v50 = vmul.f32 0.01, %v420_v47  ;;  %v1907_v41 = vld [vmem:[#allocation5 + $0x80] ss:$12 sps:$4 sm:$0xff]   ;;  %v1912_v45 = vld [vmem:[#allocation5 + $0x98] ss:$12 sps:$4 sm:$0xff]  }
 0x117   :  { %v429_v53 = vmax.f32 %v419_v44, %v424_v48  ;;  %v1915_v44 = vld [vmem:[#allocation5 + $0x244] ss:$12 sps:$4 sm:$0xff]   ;;  %v1920_v48 = vld [vmem:[#allocation5 + $0x25c] ss:$12 sps:$4 sm:$0xff]  }
 0x118   :  { %v345_v51 = vpop.f32.mrb[8].mxu0  ;;  %v386_v58 = vpop.f32.mrb[8].mxu1  ;;  %v430_v59 = vmax.f32 %v420_v47, %v425_v50  ;;  %v1913_v47 = vld [vmem:[#allocation5 + $0x240] ss:$12 sps:$4 sm:$0xff]   ;;  %v1921_v50 = vld [vmem:[#allocation5 + $0x248] ss:$12 sps:$4 sm:$0xff]  }
 0x119   :  { %v346_v54 = vadd.f32 %v345_v51, %v190_v21  ;;  %v347_v55 = vpop.f32.mrb[9].mxu0  ;;  %v387_v62 = vadd.f32 %v386_v58, %v231_v31  ;;  %v1758_v63 = vpop.f32.mrb[9].mxu1  ;;  %v2186_v5 = vpack.c.bf16 %v429_v53, %v429_v53  ;;  %v1887_v21 = vld [vmem:[#allocation5 + $0x20] ss:$12 sps:$4 sm:$0xff]   ;;  %v1900_v31 = vld [vmem:[#allocation5 + $0x1fc] ss:$12 sps:$4 sm:$0xff]  }
 0x11a   :  { %v348_v57 = vadd.f32 %v347_v55, %v192_v24  ;;  %v349_v60 = vpop.f32.mrb[10].mxu0  ;;  %v389_v1 = vpop.f32.mrb[10].mxu1  ;;  %v435_v2 = vpack.c.bf16 %v430_v59, %v430_v59  ;;  %v1888_v24 = vld [vmem:[#allocation5 + $0x1c8] ss:$12 sps:$4 sm:$0xff]   ;;  %v1918_v51 = vld [vmem:[#allocation5 + $0x258] ss:$12 sps:$4 sm:$0xff]  }
 0x11b   :  { %v2184_v61 = vadd.f32 %v405_v49, %v346_v54  ;;  %v350_v4 = vpop.f32.mrb[11].mxu0  ;;  %v423_v6 = vadd.f32 %v413_v56, %v387_v62  ;;  %v1759_v7 = vpop.f32.mrb[11].mxu1  ;;  %v1917_v49 = vld [vmem:[#allocation5 + $0xb0] ss:$12 sps:$4 sm:$0xff]   ;;  %v1922_v53 = vld [vmem:[#allocation5 + $0x188] ss:$12 sps:$4 sm:$0xff]  }
 0x11c   :  { %v422_v0 = vadd.f32 %v409_v52, %v348_v57  ;;  %1288 = vmatprep.mubr.bf16.mxu0 %v435_v2  ;;  %v1925_v52 = vld [vmem:[#allocation5 + $0x274] ss:$12 sps:$4 sm:$0xff]   ;;  %v1923_v55 = vld [vmem:[#allocation5 + $0x270] ss:$12 sps:$4 sm:$0xff]   ;;  %v1930_v56 = vld [vmem:[#allocation5 + $0x28c] ss:$12 sps:$4 sm:$0xff]  }
 0x11d   :  { %v428_v10 = vmul.f32 0.01, %v423_v6  ;;  %1289 = vmatmul.mubr.bf16.vlgmr.msra.gmra.mrb[12].mxu0 %v2186_v5  ;;  %v1926_v54 = vld [vmem:[#allocation5 + $0x260] ss:$12 sps:$4 sm:$0xff]   ;;  %v1931_v58 = vld [vmem:[#allocation5 + $0x278] ss:$12 sps:$4 sm:$0xff]  }
 0x11e   :  { %v427_v9 = vmul.f32 0.01, %v422_v0  ;;  %1298 = vmatpush1.bf16.msra.mxu0 %v1872_v3  ;;  %v1927_v57 = vld [vmem:[#allocation5 + $0x1a0] ss:$12 sps:$4 sm:$0xff]   ;;  %v1928_v59 = vld [vmem:[#allocation5 + $0x288] ss:$12 sps:$4 sm:$0xff]  }
 0x11f   :  { %v433_v13 = vmax.f32 %v423_v6, %v428_v10  ;;  %1299 = vmatprep.subr.bf16.mxu0 %v1880_v8  ;;  %v1935_v60 = vld [vmem:[#allocation5 + $0x2a4] ss:$12 sps:$4 sm:$0xff]   ;;  %v1933_v4 = vld [vmem:[#allocation5 + $0x2a0] ss:$12 sps:$4 sm:$0xff]   ;;  %v1942_v6 = vld [vmem:[#allocation5 + $0x1e8] ss:$12 sps:$4 sm:$0xff]  }
 0x120   :  { %v432_v12 = vmax.f32 %v422_v0, %v427_v9  ;;  %v1932_v62 = vld [vmem:[#allocation5 + $0x1b8] ss:$12 sps:$4 sm:$0xff]   ;;  %v1936_v63 = vld [vmem:[#allocation5 + $0x290] ss:$12 sps:$4 sm:$0xff]   ;;  %v1946_v7 = vld [vmem:[#allocation5 + $0x2c0] ss:$12 sps:$4 sm:$0xff]  }
 0x121   :  { %v2191_v17 = vpack.c.bf16 %v433_v13, %v433_v13  ;;  %v1940_v0 = vld [vmem:[#allocation5 + $0x2bc] ss:$12 sps:$4 sm:$0xff]   ;;  %v1938_v3 = vld [vmem:[#allocation5 + $0x2b8] ss:$12 sps:$4 sm:$0xff]   ;;  %v426_v9 = vmul.f32 0.01, %v2184_v61 }
 0x122   :  { %v2189_v15 = vpack.c.bf16 %v432_v12, %v432_v12  ;;  %1300 = vmatpush1.bf16.msra.mxu0 %v1878_v11  ;;  %v1937_v1 = vld [vmem:[#allocation5 + $0x1d0] ss:$12 sps:$4 sm:$0xff]   ;;  %v1950_v10 = vld [vmem:[#allocation5 + $0x2ec] ss:$12 sps:$4 sm:$0xff]   ;;  %v1948_v13 = vld [vmem:[#allocation5 + $0x2e8] ss:$12 sps:$4 sm:$0xff]  }
 0x123   :  { %1371 = vmatmul.mubr.bf16.vlgmr.msra.gmra.mrb[12].mxu1 %v2191_v17  ;;  %1301 = vmatprep.subr.bf16.mxu0 %v1885_v14  ;;  %v1943_v8 = vld [vmem:[#allocation5 + $0x2d0] ss:$12 sps:$4 sm:$0xff]   ;;  %v1947_v11 = vld [vmem:[#allocation5 + $0x200] ss:$12 sps:$4 sm:$0xff]   ;;  %v1951_v12 = vld [vmem:[#allocation5 + $0x2d8] ss:$12 sps:$4 sm:$0xff]   ;;  %v431_v14 = vmax.f32 %v2184_v61, %v426_v9 }
 0x124   :  { %1329 = vmatprep.mubr.bf16.mxu0 %v2189_v15  ;;  %1696 = vmatpush3.bf16.msra.mxu1 %v1882_v16  ;;  %v1953_v16 = vld [vmem:[#allocation5 + $0x2f0] ss:$12 sps:$4 sm:$0xff]   ;;  %v1957_v61 = vld [vmem:[#allocation5 + $0x338] ss:$12 sps:$4 sm:$0xff]  }
 0x125   :  { %1411 = vmatprep.mubr.bf16.mxu1 %v435_v2  ;;  %1697 = vmatprep.subr.bf16.mxu1 %v1886_v18  ;;  %v1941_v2 = vld [vmem:[#allocation5 + $0x2a8] ss:$12 sps:$4 sm:$0xff]   ;;  %v436_v18 = vpack.c.bf16 %v431_v14, %v431_v14 }
 0x126   :  { %1302 = vmatpush1.bf16.msra.mxu0 %v1883_v19  ;;  %v1954_v19 = vld [vmem:[#allocation5 + $0x230] ss:$12 sps:$4 sm:$0xff]  }
 0x127   :  { %1303 = vmatprep.subr.bf16.mxu0 %v1890_v20  ;;  %v1955_v20 = vld [vmem:[#allocation5 + $0x308] ss:$12 sps:$4 sm:$0xff]  }
 0x128   :  { %1698 = vmatpush3.bf16.msra.mxu1 %v1887_v21  ;;  %v1956_v21 = vld [vmem:[#allocation5 + $0x320] ss:$12 sps:$4 sm:$0xff]  }
 0x129   :  { %1699 = vmatprep.subr.bf16.mxu1 %v1891_v23  ;;  %v1958_v23 = vld [vmem:[#allocation5 + $0x350] ss:$12 sps:$4 sm:$0xff]  }
 0x12a   :  { %1304 = vmatpush1.bf16.msra.mxu0 %v1888_v24  ;;  %v1959_v24 = vld [vmem:[#allocation5 + $0x368] ss:$12 sps:$4 sm:$0xff]  }
 0x12b   :  { %1305 = vmatprep.subr.bf16.mxu0 %v1895_v25  ;;  %v1960_v25 = vld [vmem:[#allocation5 + $0x380] ss:$12 sps:$4 sm:$0xff]  }
 0x12c   :  { %1700 = vmatpush3.bf16.msra.mxu1 %v1892_v26  ;;  %v1961_v26 = vld [vmem:[#allocation5 + $0x398] ss:$12 sps:$4 sm:$0xff]  }
 0x12d   :  { %1701 = vmatprep.subr.bf16.mxu1 %v1896_v27  ;;  %v1962_v27 = vld [vmem:[#allocation5 + $0x3b0] ss:$12 sps:$4 sm:$0xff]  }
 0x12e   :  { %1306 = vmatpush1.bf16.msra.mxu0 %v1893_v29 }
 0x12f   :  { %1307 = vmatprep.subr.bf16.mxu0 %v1900_v31 }
 0x130   :  { %1702 = vmatpush3.bf16.msra.mxu1 %v1897_v32 }
 0x131   :  { %1703 = vmatprep.subr.bf16.mxu1 %v1901_v33 }
 0x132   :  { %1308 = vmatpush1.bf16.msra.mxu0 %v1898_v34 }
 0x133   :  { %1309 = vmatprep.subr.bf16.mxu0 %v1905_v35 }
 0x134   :  { %1704 = vmatpush3.bf16.msra.mxu1 %v1902_v36 }
 0x135   :  { %1705 = vmatprep.subr.bf16.mxu1 %v1906_v37 }
 0x136   :  { %1310 = vmatpush1.bf16.msra.mxu0 %v1903_v38 }
 0x137   :  { %1311 = vmatprep.subr.bf16.mxu0 %v1910_v39  ;;  %v599_v39 = vld [vmem:[%s2243_s6] sm:$0x7] }
 0x138   :  { %1706 = vmatpush3.bf16.msra.mxu1 %v1907_v41  ;;  %v604_v41 = vrot.slane %v599_v39, %v2168_v28 }
 0x139   :  { %1707 = vmatprep.subr.bf16.mxu1 %v1911_v42 }
 0x13a   :  { %1312 = vmatpush1.bf16.msra.mxu0 %v1908_v43 }
 0x13b   :  { %1313 = vmatprep.subr.bf16.mxu0 %v1915_v44 }
 0x13c   :  { %1708 = vmatpush3.bf16.msra.mxu1 %v1912_v45 }
 0x13d   :  { %1709 = vmatprep.subr.bf16.mxu1 %v1916_v46  ;;  %v1505_v46 = vld [vmem:[%s2244_s7] sm:$0x7] }
 0x13e   :  { %1314 = vmatpush1.bf16.msra.mxu0 %v1913_v47  ;;  %v1518_v9 = vrot.slane %v1505_v46, %v2179_v40 }
 0x13f   :  { %1315 = vmatprep.subr.bf16.mxu0 %v1920_v48 }
 0x140   :  { %1710 = vmatpush3.bf16.msra.mxu1 %v1917_v49  ;;  %v612_v49 = vrot.slane %v599_v39, %v2179_v40 }
 0x141   :  { %1717 = vmatprep.subr.bf16.mxu1 %v1921_v50 }
 0x142   :  { %1316 = vmatpush1.bf16.msra.mxu0 %v1918_v51 }
 0x143   :  { %1412 = vmatmul.mubr.bf16.vlgmr.msra.gmra.mrb[16].mxu1 %v2186_v5  ;;  %1317 = vmatprep.subr.bf16.mxu0 %v1925_v52  ;;  %v1945_v5 = vld [vmem:[#allocation5 + $0x2d4] ss:$12 sps:$4 sm:$0xff]   ;;  %v1510_v52 = vrot.slane %v1505_v46, %v2168_v28 }
 0x144   :  { %1718 = vmatpush3.bf16.msra.mxu1 %v1922_v53  ;;  %1451 = vmatprep.mubr.bf16.mxu1 %v2189_v15  ;;  %v1952_v15 = vld [vmem:[#allocation5 + $0x218] ss:$12 sps:$4 sm:$0xff]  }
 0x145   :  { %1719 = vmatprep.subr.bf16.mxu1 %v1926_v54 }
 0x146   :  { %1318 = vmatpush1.bf16.msra.mxu0 %v1923_v55  ;;  %v1514_v55 = vrot.slane %v1505_v46, %v2174_v30 }
 0x147   :  { %1319 = vmatprep.subr.bf16.mxu0 %v1930_v56 }
 0x148   :  { %1720 = vmatpush3.bf16.msra.mxu1 %v1927_v57 }
 0x149   :  { %1721 = vmatprep.subr.bf16.mxu1 %v1931_v58 }
 0x14a   :  { %1320 = vmatpush1.bf16.msra.mxu0 %v1928_v59 }
 0x14b   :  { %1321 = vmatprep.subr.bf16.mxu0 %v1935_v60 }
 0x14c   :  { %1722 = vmatpush3.bf16.msra.mxu1 %v1932_v62 }
 0x14d   :  { %1723 = vmatprep.subr.bf16.mxu1 %v1936_v63 }
 0x14e   :  { %1322 = vmatpush1.bf16.msra.mxu0 %v1933_v4 }
 0x14f   :  { %1323 = vmatprep.subr.bf16.mxu0 %v1940_v0 }
 0x150   :  { %1724 = vmatpush3.bf16.msra.mxu1 %v1937_v1 }
 0x151   :  { %1725 = vmatprep.subr.bf16.mxu1 %v1941_v2 }
 0x152   :  { %1324 = vmatpush1.bf16.msra.mxu0 %v1938_v3 }
 0x153   :  { %1325 = vmatprep.subr.bf16.mxu0 %v1945_v5 }
 0x154   :  { %1726 = vmatpush3.bf16.msra.mxu1 %v1942_v6 }
 0x155   :  { %1727 = vmatprep.subr.bf16.mxu1 %v1946_v7 }
 0x156   :  { %1326 = vmatpush1.bf16.msra.mxu0 %v1943_v8 }
 0x157   :  { %1327 = vmatprep.subr.bf16.mxu0 %v1950_v10 }
 0x158   :  { %1728 = vmatpush3.bf16.msra.mxu1 %v1947_v11 }
 0x159   :  { %1729 = vmatprep.subr.bf16.mxu1 %v1951_v12  ;;  %v1690_v12 = vld [vmem:[%s2245_s8] ss:$0 sm:$0xff] }
 0x15a   :  { %1328 = vmatpush1.bf16.msra.mxu0 %v1948_v13 }
 0x15c   :  { %1730 = vmatpush3.bf16.msra.mxu1 %v1952_v15 }
 0x15d   :  { %1330 = vmatmul.mubr.bf16.vlgmr.msra.gmra.mrb[12].mxu0 %v436_v18  ;;  %1731 = vmatprep.subr.bf16.mxu1 %v1953_v16 }
 0x160   :  { %1732 = vmatpush3.bf16.msra.mxu1 %v1954_v19 }
 0x161   :  { %1760 = vmatprep.subr.bf16.mxu1 %v2041_v22 }
 0x163   :  { %1452 = vmatmul.mubr.bf16.vlgmr.msra.gmra.mrb[20].mxu1 %v436_v18 }
 0x164   :  { %1761 = vmatpush3.bf16.msra.mxu1 %v1955_v20  ;;  %1776 = vmatprep.mubr.msk.bf16.mxu1 %vm2042_vm3, %v2041_v22 }
 0x165   :  { %1762 = vmatprep.subr.bf16.mxu1 %v2041_v22 }
 0x168   :  { %1763 = vmatpush3.bf16.msra.mxu1 %v1956_v21 }
 0x169   :  { %1764 = vmatprep.subr.bf16.mxu1 %v2041_v22 }
 0x16c   :  { %1765 = vmatpush3.bf16.msra.mxu1 %v1957_v61 }
 0x16d   :  { %1766 = vmatprep.subr.bf16.mxu1 %v2041_v22 }
 0x170   :  { %1767 = vmatpush3.bf16.msra.mxu1 %v1958_v23 }
 0x171   :  { %1768 = vmatprep.subr.bf16.mxu1 %v2041_v22 }
 0x174   :  { %1769 = vmatpush3.bf16.msra.mxu1 %v1959_v24 }
 0x175   :  { %1770 = vmatprep.subr.bf16.mxu1 %v2041_v22 }
 0x178   :  { %1771 = vmatpush3.bf16.msra.mxu1 %v1960_v25 }
 0x179   :  { %1772 = vmatprep.subr.bf16.mxu1 %v2041_v22 }
 0x17c   :  { %1773 = vmatpush3.bf16.msra.mxu1 %v1961_v26 }
 0x17d   :  { %1774 = vmatprep.subr.bf16.mxu1 %v2041_v22  ;;  %v608_v22 = vrot.slane %v599_v39, %v2174_v30 }
 0x180   :  { %1775 = vmatpush3.bf16.msra.mxu1 %v1962_v27 }
 0x183   :  { %1777 = vmatmul.mubr.bf16.vlgmr.msra.gmra.mrb[24].mxu1 %v2191_v17 }
 0x1f6   :  { %v1372_v29 = vpop.f32.mrb[12].mxu1 }
 0x1f7   :  { %v1374_v31 = vpop.f32.mrb[13].mxu1 }
 0x1f8   :  { %v1376_v32 = vpop.f32.mrb[14].mxu1 }
 0x1f9   :  { %v1377_v33 = vpop.f32.mrb[15].mxu1 }
 0x216   :  { %v1711_v34 = vpop.f32.mrb[16].mxu1 }
 0x217   :  { %v1712_v35 = vpop.f32.mrb[17].mxu1 }
 0x218   :  { %v1713_v36 = vadd.f32 %v1712_v35, %v1711_v34  ;;  %v1714_v37 = vpop.f32.mrb[18].mxu1 }
 0x219   :  { %v1715_v38 = vpop.f32.mrb[19].mxu1 }
 0x21a   :  { %v1414_v58 = vadd.f32 %v1713_v36, %v612_v49 }
 0x230   :  { %v1331_v42 = vpop.f32.mrb[12].mxu0 }
 0x231   :  { %v1780_v43 = vadd.f32 %v1331_v42, %v604_v41  ;;  %v1333_v17 = vpop.f32.mrb[13].mxu0 }
 0x232   :  { %v1782_v44 = vadd.f32 %v1333_v17, %v608_v22  ;;  %v1335_v45 = vpop.f32.mrb[14].mxu0 }
 0x233   :  { %v1781_v47 = vadd.f32 %v1780_v43, %v1372_v29  ;;  %v1336_v48 = vpop.f32.mrb[15].mxu0 }
 0x234   :  { %v1783_v50 = vadd.f32 %v1782_v44, %v1374_v31 }
 0x235   :  { %v1499_v51 = vmul.f32 0.01, %v1781_v47 }
 0x236   :  { %v1500_v53 = vmul.f32 0.01, %v1783_v50  ;;  %v1733_v54 = vpop.f32.mrb[20].mxu1 }
 0x237   :  { %v1502_v56 = vmax.f32 %v1781_v47, %v1499_v51  ;;  %v1734_v57 = vpop.f32.mrb[21].mxu1 }
 0x238   :  { %v1503_v59 = vmax.f32 %v1783_v50, %v1500_v53  ;;  %v1735_v60 = vadd.f32 %v1734_v57, %v1733_v54  ;;  %v1736_v62 = vpop.f32.mrb[22].mxu1 }
 0x239   :  { %v1737_v63 = vpop.f32.mrb[23].mxu1  ;;  %v1522_v4 = vmul.f32 %v1510_v52, %v1502_v56 }
 0x23a   :  { %v1454_v0 = vadd.f32 %v1735_v60, %v1414_v58  ;;  %v1523_v1 = vmul.f32 %v1514_v55, %v1503_v59 }
 0x23c   :  { %v1525_v2 = vadd.f32 %v1523_v1, %v1522_v4 }
 0x256   :  { %v1493_v3 = vpop.f32.mrb[24].mxu1 }
 0x257   :  { %v1494_v5 = vadd.f32 %v1493_v3, %v1454_v0  ;;  %v1778_v6 = vpop.f32.mrb[25].mxu1 }
 0x258   :  { %v1496_v7 = vpop.f32.mrb[26].mxu1 }
 0x259   :  { %v1501_v28 = vmul.f32 0.01, %v1494_v5  ;;  %v1779_v8 = vpop.f32.mrb[27].mxu1 }
 0x25b   :  { %v1504_v30 = vmax.f32 %v1494_v5, %v1501_v28 }
 0x25d   :  { %v1524_v10 = vmul.f32 %v1518_v9, %v1504_v30 }
 0x25f   :  { %v1526_v11 = vadd.f32 %v1525_v2, %v1524_v10 }
 0x261   :  { %1527 = vadd.xlane.f32.xlu0 %v1526_v11 }
 0x2ee   :  { %v1528_v13 = vpop.xlane.xlu0 %1527 }
 0x2ef   :  { %v1536_v14 = vadd.f32 %v1690_v12, %v1528_v13 }
 0x2f1   :  { %1537 = vst [vmem:[#allocation7] sm:$0xff] %v1536_v14 }
 0x2f2   :  { %2018 = shalt.err (!%p2015_p6)
}
 0x2f3   :  { %s2019_s27 = scalar_lea.hbm %s2246_s9, 128 }
 0x2f4   :  { %p2020_p7 = scmp.ne.s32.totalorder %s2246_s9, %s2019_s27  ;;  %p2023_p8 = scmp.lt.u32.totalorder %s2019_s27, %s2246_s9 }
 0x2f6   :  { %p2025_p9 = pnand %p2023_p8, %p2020_p7 }
 0x2f8   :  { %2028 = shalt.err (!%p2025_p9)
}
 0x2f9   :  { %1547 = dma.vmem_to_hbm [thread:$0]  %s1545_s23, 128, %s2246_s9, [#allocation4]  }
 0x2fa   :  { %2033 = dma.done.wait [#allocation4], 128  }
 0x2fb   :  { %2034 = vsyncadd [#allocation4], 4294967168 }
 0x2fc   :  { %1551 = vsyncpa [#allocation3], 1 }
 0x2fd   :  { %1552 = vsyncpa [#allocation6], 1 }
 0x2fe   :  { %1553 = vsyncpa [#allocation4], 1 }

</bundles_post_ra>
